<compile_context>
chip_gen: v7x
topology: tpu7x:2x2x1
jax: 0.10.0
libtpu: 0.0.40
codegen_flags: <defaults>
</compile_context>

<pallas_src>
import jax
import jax.numpy as jnp
from jax.experimental import pallas as pl
from jax.experimental.pallas import tpu as pltpu

# ---- static problem sizes (small, consistent with the module's forward) ----
B = 2           # batch
CIN = 3         # image channels
H = 16          # image height
W = 16          # image width (also BEV width)
C1 = 8          # feature channels
Z = 8           # BEV depth bins
NCLS = 4        # output classes
HW = H * W      # 256 image pixels
ZW = Z * W      # 128 BEV cells
BHW = B * HW    # 512
BZW = B * ZW    # 256
KC = 9 * C1     # 72 (channel-padded im2col contraction for both 3x3 convs)
CALIB_NORM = 1.0 / 128.0

# column offsets inside the packed weight array (big slices are 128-aligned)
_W1_OFF = 0          # (C1, 72) frontend weights; bias folded at col 4*C1 + 7
_W2_OFF = 128        # (C1, 72) topdown weights
_BT_OFF = 256        # (C1, 1)  transformer bias
_B2_OFF = 257        # (C1, 1)  topdown bias
_BC_OFF = 258        # (C1, 1)  classifier bias (rows NCLS.. zero)
_WC_OFF = 264        # (C1, C1) classifier weights (rows NCLS.. zero)
_WPK_COLS = 272


def _pon_kernel(scale_ref, img_ref, mask_ref, wpk_ref, wtt_ref, out_ref):
    """Whole batch in one grid step; batches are concatenated on lanes.

    scale_ref : (B,) f32 SMEM              per-batch calib scale
    img_ref   : (C1, B*HW) f32             image; channels padded to C1, row 7 = ones
    mask_ref  : (9, B*HW + B*ZW) f32       per-tap boundary masks (frontend | topdown)
    wpk_ref   : (C1, 272) f32              packed w1|w2|biases|classifier
    wtt_ref   : (HW, ZW) bf16              transformer weight, transposed
    out_ref   : (C1, B*ZW) f32             logits^T; rows 0..NCLS-1 valid
    """

    def conv3x3_stack(x, lane_off):
        # 3x3 taps of a lane-flattened tile (lane = b*n + y*W + x) via XLU lane
        # rolls + precomputed masks.  Rolls that leak across the image border
        # or the batch boundary land only on masked-out positions.
        n = x.shape[1]
        taps = []
        for ky in range(3):
            for kx in range(3):
                t, dy, dx = ky * 3 + kx, ky - 1, kx - 1
                s = dy * W + dx
                if s == 0:
                    taps.append(x)                       # center tap: always valid
                else:
                    mask = mask_ref[t:t + 1, lane_off:lane_off + n]   # (1, n)
                    taps.append(pltpu.roll(x, (-s) % n, axis=1) * mask)
        # bf16 MXU operands, f32 accumulation happens in the dot below.
        return jnp.concatenate(taps, axis=0).astype(jnp.bfloat16)    # (72, n)

    img = img_ref[...]                                               # (C1, B*HW)

    # ---- frontend: 3x3 conv + ReLU as ONE K=72 matmul (bias folded via the
    #      all-ones image row 7 hitting w1t column 4*C1+7) --------------------
    patches = conv3x3_stack(img, 0)                                  # (72, B*HW)
    w1t = wpk_ref[:, _W1_OFF:_W1_OFF + KC].astype(jnp.bfloat16)      # (C1, 72)
    f_t = jnp.maximum(
        jnp.dot(w1t, patches, preferred_element_type=jnp.float32), 0.0)   # (C1, B*HW)

    # ---- transformer: calib-scaled dense image->BEV map (bf16, f32 acc) -----
    f_bf = f_t.astype(jnp.bfloat16)
    wtt = wtt_ref[...]                                               # (HW, ZW) bf16
    pieces = [jnp.dot(f_bf[:, b * HW:(b + 1) * HW], wtt,
                      preferred_element_type=jnp.float32) * scale_ref[b]
              for b in range(B)]
    bev_t = jnp.concatenate(pieces, axis=1) + wpk_ref[:, _BT_OFF:_BT_OFF + 1]

    # ---- topdown: 3x3 conv + ReLU on the register-resident BEV tile ---------
    stack2 = conv3x3_stack(bev_t, BHW)                               # (72, B*ZW)
    w2t = wpk_ref[:, _W2_OFF:_W2_OFF + KC].astype(jnp.bfloat16)      # (C1, 72)
    td_t = jnp.maximum(
        jnp.dot(w2t, stack2, preferred_element_type=jnp.float32)
        + wpk_ref[:, _B2_OFF:_B2_OFF + 1], 0.0)                      # (C1, B*ZW)

    # ---- classifier: 1x1 conv (rows NCLS..C1-1 of weights/bias are zero) ----
    out_ref[...] = (jnp.dot(wpk_ref[:, _WC_OFF:_WC_OFF + C1], td_t,
                            preferred_element_type=jnp.float32)
                    + wpk_ref[:, _BC_OFF:_BC_OFF + 1])               # (C1, B*ZW)


def _build_masks():
    """Per-tap border validity masks for both 3x3 convs, batch-tiled on lanes."""
    def masks_for(height, n_per_batch):
        p = jnp.arange(n_per_batch)
        yy, xx = p // W, p % W
        rows = []
        for ky in range(3):
            for kx in range(3):
                dy, dx = ky - 1, kx - 1
                ok = ((yy + dy >= 0) & (yy + dy < height) &
                      (xx + dx >= 0) & (xx + dx < W))
                rows.append(jnp.tile(ok, (B,)))
        return jnp.stack(rows)
    fe = masks_for(H, HW)                                    # (9, B*HW)
    td = masks_for(Z, ZW)                                    # (9, B*ZW)
    return jnp.concatenate([fe, td], axis=1).astype(jnp.float32)   # (9, 768)


def _pack_weights(p):
    """Pack all small weights/biases into one (C1, 272) f32 array."""
    w1 = jnp.zeros((9, C1, C1), jnp.float32)
    w1 = w1.at[:, :CIN, :].set(p["W1"].reshape(9, CIN, C1))
    w1 = w1.at[4, C1 - 1, :].set(p["b1"].reshape(C1))        # bias via center-tap ones row
    w1t = w1.reshape(KC, C1).T                               # (C1, 72)
    w2t = p["W2"].reshape(KC, C1).T                          # (C1, 72)
    wct = jnp.zeros((C1, C1), jnp.float32).at[:NCLS, :].set(p["Wc"].T)
    bc = jnp.zeros((C1,), jnp.float32).at[:NCLS].set(p["bc"].reshape(NCLS))

    wpk = jnp.zeros((C1, _WPK_COLS), jnp.float32)
    wpk = wpk.at[:, _W1_OFF:_W1_OFF + KC].set(w1t)
    wpk = wpk.at[:, _W2_OFF:_W2_OFF + KC].set(w2t)
    wpk = wpk.at[:, _BT_OFF].set(p["bt"].reshape(C1))
    wpk = wpk.at[:, _B2_OFF].set(p["b2"].reshape(C1))
    wpk = wpk.at[:, _BC_OFF].set(bc)
    wpk = wpk.at[:, _WC_OFF:_WC_OFF + C1].set(wct)
    return wpk


@jax.jit
def pyramid_occupancy_forward(image_nchw, calib, params):
    """image_nchw: (B, CIN, H, W), calib: (B, 3, 3) -> logits (B, NCLS, Z, W)."""
    # image -> (C1, B*HW): channels on sublanes (padded to C1), batch||pixels
    # on lanes; the last (padding) row is all ones and carries the frontend bias.
    img = jnp.transpose(image_nchw, (1, 0, 2, 3)).reshape(CIN, BHW)
    img_pad = jnp.concatenate(
        [img,
         jnp.zeros((C1 - CIN - 1, BHW), jnp.float32),
         jnp.ones((1, BHW), jnp.float32)], axis=0)           # (C1, B*HW)

    masks = _build_masks()                                   # (9, B*HW + B*ZW)
    wpk = _pack_weights(params)                              # (C1, 272)
    wtt = params["Wt"].T.astype(jnp.bfloat16)                # (HW, ZW) bf16
    scale = (calib[:, 0, 0] * CALIB_NORM).astype(jnp.float32)  # (B,) -> SMEM

    grid_spec = pltpu.PrefetchScalarGridSpec(
        num_scalar_prefetch=0,
        grid=(1,),                                           # whole batch in one step
        in_specs=[
            pl.BlockSpec(memory_space=pltpu.MemorySpace.SMEM),      # scale
            pl.BlockSpec((C1, BHW), lambda i: (0, 0)),              # image
            pl.BlockSpec((9, BHW + BZW), lambda i: (0, 0)),         # masks
            pl.BlockSpec((C1, _WPK_COLS), lambda i: (0, 0)),        # packed weights
            pl.BlockSpec((HW, ZW), lambda i: (0, 0)),               # Wt^T (bf16)
        ],
        out_specs=pl.BlockSpec((C1, BZW), lambda i: (0, 0)),
    )

    out = pl.pallas_call(
        _pon_kernel,
        out_shape=jax.ShapeDtypeStruct((C1, BZW), jnp.float32),
        grid_spec=grid_spec,
        compiler_params=pltpu.CompilerParams(
            dimension_semantics=("arbitrary",)),
    )(scale, img_pad, masks, wpk, wtt)

    # rows 0..NCLS-1 hold the logits; lanes are b*ZW + z*W + w.
    return out[:NCLS].reshape(NCLS, B, Z, W).transpose(1, 0, 2, 3)


def reference_forward(image_nchw, calib, p):
    """Pure-JAX reference; mirrors the kernel's bf16 operand quantization."""
    def bdot(a, b):
        return jnp.dot(a.astype(jnp.bfloat16), b.astype(jnp.bfloat16),
                       preferred_element_type=jnp.float32)

    img = jnp.transpose(image_nchw, (0, 2, 3, 1))            # (B, H, W, CIN)
    imgp = jnp.pad(img, ((0, 0), (1, 1), (1, 1), (0, 0)))
    outs = []
    for b in range(B):
        cols = [imgp[b, ky:ky + H, kx:kx + W, :].reshape(HW, CIN)
                for ky in range(3) for kx in range(3)]
        patches = jnp.concatenate(cols, axis=1)              # (HW, 27)
        f = jnp.maximum(bdot(patches, p["W1"].reshape(9 * CIN, C1)) + p["b1"], 0.0)
        scale = calib[b, 0, 0] * CALIB_NORM
        bev = bdot(p["Wt"], f) * scale + p["bt"]             # (ZW, C1)
        bevp = jnp.pad(bev.reshape(Z, W, C1), ((1, 1), (1, 1), (0, 0)))
        cols2 = [bevp[ky:ky + Z, kx:kx + W, :].reshape(ZW, C1)
                 for ky in range(3) for kx in range(3)]
        patches2 = jnp.concatenate(cols2, axis=1)            # (ZW, 72)
        td = jnp.maximum(bdot(patches2, p["W2"].reshape(KC, C1)) + p["b2"], 0.0)
        outs.append(td @ p["Wc"] + p["bc"])                  # (ZW, NCLS)
    out = jnp.stack(outs)
    return jnp.transpose(out.reshape(B, Z, W, NCLS), (0, 3, 1, 2))


def init_params(key):
    ks = jax.random.split(key, 8)
    return {
        "W1": jax.random.normal(ks[0], (3, 3, CIN, C1), jnp.float32) * 0.1,
        "b1": jax.random.normal(ks[1], (1, C1), jnp.float32) * 0.01,
        "Wt": jax.random.normal(ks[2], (ZW, HW), jnp.float32) * 0.05,
        "bt": jax.random.normal(ks[3], (1, C1), jnp.float32) * 0.01,
        "W2": jax.random.normal(ks[4], (3, 3, C1, C1), jnp.float32) * 0.1,
        "b2": jax.random.normal(ks[5], (1, C1), jnp.float32) * 0.01,
        "Wc": jax.random.normal(ks[6], (C1, NCLS), jnp.float32) * 0.1,
        "bc": jax.random.normal(ks[7], (1, NCLS), jnp.float32) * 0.01,
    }


if __name__ == "__main__":
    root = jax.random.PRNGKey(0)
    k_img, k_par = jax.random.split(root)

    image = jax.random.normal(k_img, (B, CIN, H, W), jnp.float32)   # NCHW
    # simple deterministic intrinsics: fx=fy=100+b, cx=cy=8
    calib = jnp.stack([
        jnp.array([[100.0 + b, 0.0, 8.0],
                   [0.0, 100.0 + b, 8.0],
                   [0.0, 0.0, 1.0]], jnp.float32)
        for b in range(B)
    ])
    params = init_params(k_par)

    logits = pyramid_occupancy_forward(image, calib, params)
    jax.block_until_ready(logits)
    assert logits.shape == (B, NCLS, Z, W), logits.shape

    ref = reference_forward(image, calib, params)
    err = float(jnp.max(jnp.abs(logits - ref)))
    assert jnp.allclose(logits, ref, atol=2e-2, rtol=2e-2), err

    print("KERNEL_OK")
</pallas_src>

<mosaic_0001>
module attributes {stable_mosaic.version = 11 : i64} {
  func.func @_pon_kernel(%arg0: i32, %arg1: memref<2xf32, #tpu.memory_space<smem>>, %arg2: memref<8x512xf32, #tpu.memory_space<vmem>>, %arg3: memref<9x768xf32, #tpu.memory_space<vmem>>, %arg4: memref<8x272xf32, #tpu.memory_space<vmem>>, %arg5: memref<256x128xbf16, #tpu.memory_space<vmem>>, %arg6: memref<8x256xf32, #tpu.memory_space<vmem>>) attributes {dimension_semantics = [#tpu.dimension_semantics<arbitrary>], iteration_bounds = array<i64: 1>, scalar_prefetch = 0 : i64, scratch_operands = 0 : i64, tpu.core_type = #tpu.core_type<tc>, window_params = [{transform_indices = @transform_0, window_bounds = array<i64: 2>}, {pipeline_mode = #tpu.pipeline_mode<synchronous>, transform_indices = @transform_1, window_bounds = array<i64: 8, 512>}, {pipeline_mode = #tpu.pipeline_mode<synchronous>, transform_indices = @transform_2, window_bounds = array<i64: 9, 768>}, {pipeline_mode = #tpu.pipeline_mode<synchronous>, transform_indices = @transform_3, window_bounds = array<i64: 8, 272>}, {pipeline_mode = #tpu.pipeline_mode<synchronous>, transform_indices = @transform_4, window_bounds = array<i64: 256, 128>}, {pipeline_mode = #tpu.pipeline_mode<synchronous>, transform_indices = @transform_5, window_bounds = array<i64: 8, 256>}]} {
    %c0 = arith.constant 0 : index
    %c0_0 = arith.constant 0 : index
    %0 = vector.load %arg2[%c0, %c0_0] : memref<8x512xf32, #tpu.memory_space<vmem>>, vector<8x512xf32>
    %c0_1 = arith.constant 0 : index
    %c0_2 = arith.constant 0 : index
    %1 = vector.load %arg3[%c0_1, %c0_2] : memref<9x768xf32, #tpu.memory_space<vmem>>, vector<1x512xf32>
    %c17_i32 = arith.constant 17 : i32
    %2 = tpu.dynamic_rotate %0 by %c17_i32 dim 1 : vector<8x512xf32>, i32 -> vector<8x512xf32>
    %3 = vector.broadcast %1 : vector<1x512xf32> to vector<8x512xf32>
    %4 = arith.mulf %2, %3 : vector<8x512xf32>
    %c1 = arith.constant 1 : index
    %c0_3 = arith.constant 0 : index
    %5 = vector.load %arg3[%c1, %c0_3] : memref<9x768xf32, #tpu.memory_space<vmem>>, vector<1x512xf32>
    %c16_i32 = arith.constant 16 : i32
    %6 = tpu.dynamic_rotate %0 by %c16_i32 dim 1 : vector<8x512xf32>, i32 -> vector<8x512xf32>
    %7 = vector.broadcast %5 : vector<1x512xf32> to vector<8x512xf32>
    %8 = arith.mulf %6, %7 : vector<8x512xf32>
    %c2 = arith.constant 2 : index
    %c0_4 = arith.constant 0 : index
    %9 = vector.load %arg3[%c2, %c0_4] : memref<9x768xf32, #tpu.memory_space<vmem>>, vector<1x512xf32>
    %c15_i32 = arith.constant 15 : i32
    %10 = tpu.dynamic_rotate %0 by %c15_i32 dim 1 : vector<8x512xf32>, i32 -> vector<8x512xf32>
    %11 = vector.broadcast %9 : vector<1x512xf32> to vector<8x512xf32>
    %12 = arith.mulf %10, %11 : vector<8x512xf32>
    %c3 = arith.constant 3 : index
    %c0_5 = arith.constant 0 : index
    %13 = vector.load %arg3[%c3, %c0_5] : memref<9x768xf32, #tpu.memory_space<vmem>>, vector<1x512xf32>
    %c1_i32 = arith.constant 1 : i32
    %14 = tpu.dynamic_rotate %0 by %c1_i32 dim 1 : vector<8x512xf32>, i32 -> vector<8x512xf32>
    %15 = vector.broadcast %13 : vector<1x512xf32> to vector<8x512xf32>
    %16 = arith.mulf %14, %15 : vector<8x512xf32>
    %c5 = arith.constant 5 : index
    %c0_6 = arith.constant 0 : index
    %17 = vector.load %arg3[%c5, %c0_6] : memref<9x768xf32, #tpu.memory_space<vmem>>, vector<1x512xf32>
    %c511_i32 = arith.constant 511 : i32
    %18 = tpu.dynamic_rotate %0 by %c511_i32 dim 1 : vector<8x512xf32>, i32 -> vector<8x512xf32>
    %19 = vector.broadcast %17 : vector<1x512xf32> to vector<8x512xf32>
    %20 = arith.mulf %18, %19 : vector<8x512xf32>
    %c6 = arith.constant 6 : index
    %c0_7 = arith.constant 0 : index
    %21 = vector.load %arg3[%c6, %c0_7] : memref<9x768xf32, #tpu.memory_space<vmem>>, vector<1x512xf32>
    %c497_i32 = arith.constant 497 : i32
    %22 = tpu.dynamic_rotate %0 by %c497_i32 dim 1 : vector<8x512xf32>, i32 -> vector<8x512xf32>
    %23 = vector.broadcast %21 : vector<1x512xf32> to vector<8x512xf32>
    %24 = arith.mulf %22, %23 : vector<8x512xf32>
    %c7 = arith.constant 7 : index
    %c0_8 = arith.constant 0 : index
    %25 = vector.load %arg3[%c7, %c0_8] : memref<9x768xf32, #tpu.memory_space<vmem>>, vector<1x512xf32>
    %c496_i32 = arith.constant 496 : i32
    %26 = tpu.dynamic_rotate %0 by %c496_i32 dim 1 : vector<8x512xf32>, i32 -> vector<8x512xf32>
    %27 = vector.broadcast %25 : vector<1x512xf32> to vector<8x512xf32>
    %28 = arith.mulf %26, %27 : vector<8x512xf32>
    %c8 = arith.constant 8 : index
    %c0_9 = arith.constant 0 : index
    %29 = vector.load %arg3[%c8, %c0_9] : memref<9x768xf32, #tpu.memory_space<vmem>>, vector<1x512xf32>
    %c495_i32 = arith.constant 495 : i32
    %30 = tpu.dynamic_rotate %0 by %c495_i32 dim 1 : vector<8x512xf32>, i32 -> vector<8x512xf32>
    %31 = vector.broadcast %29 : vector<1x512xf32> to vector<8x512xf32>
    %32 = arith.mulf %30, %31 : vector<8x512xf32>
    %33 = tpu.concatenate %4, %8, %12, %16, %0, %20, %24, %28, %32 in 0 : vector<8x512xf32>, vector<8x512xf32>, vector<8x512xf32>, vector<8x512xf32>, vector<8x512xf32>, vector<8x512xf32>, vector<8x512xf32>, vector<8x512xf32>, vector<8x512xf32> -> vector<72x512xf32>
    %34 = arith.truncf %33 : vector<72x512xf32> to vector<72x512xbf16>
    %c0_10 = arith.constant 0 : index
    %c0_11 = arith.constant 0 : index
    %35 = vector.load %arg4[%c0_10, %c0_11] : memref<8x272xf32, #tpu.memory_space<vmem>>, vector<8x72xf32>
    %36 = arith.truncf %35 : vector<8x72xf32> to vector<8x72xbf16>
    %cst = arith.constant dense<0.000000e+00> : vector<8x512xf32>
    %37 = tpu.matmul %36, %34, %cst {dimension_numbers = #tpu.dot_dimension_numbers<[1], [0], [0], [1], [0, 0, 1, 1], [], []>} : vector<8x72xbf16>, vector<72x512xbf16>, vector<8x512xf32> -> vector<8x512xf32>
    %cst_12 = arith.constant 0.000000e+00 : f32
    %38 = vector.broadcast %cst_12 : f32 to vector<8x512xf32>
    %39 = arith.maximumf %37, %38 : vector<8x512xf32>
    %40 = arith.truncf %39 : vector<8x512xf32> to vector<8x512xbf16>
    %c0_13 = arith.constant 0 : index
    %c0_14 = arith.constant 0 : index
    %41 = vector.load %arg5[%c0_13, %c0_14] : memref<256x128xbf16, #tpu.memory_space<vmem>>, vector<256x128xbf16>
    %42 = vector.extract_strided_slice %40 {offsets = [0, 0], sizes = [8, 256], strides = [1, 1]} : vector<8x512xbf16> to vector<8x256xbf16>
    %cst_15 = arith.constant dense<0.000000e+00> : vector<8x128xf32>
    %43 = tpu.matmul %42, %41, %cst_15 {dimension_numbers = #tpu.dot_dimension_numbers<[1], [0], [0], [1], [0, 0, 1, 1], [], []>} : vector<8x256xbf16>, vector<256x128xbf16>, vector<8x128xf32> -> vector<8x128xf32>
    %c0_16 = arith.constant 0 : index
    %44 = memref.load %arg1[%c0_16] : memref<2xf32, #tpu.memory_space<smem>>
    %45 = vector.broadcast %44 : f32 to vector<8x128xf32>
    %46 = arith.mulf %43, %45 : vector<8x128xf32>
    %47 = vector.extract_strided_slice %40 {offsets = [0, 256], sizes = [8, 256], strides = [1, 1]} : vector<8x512xbf16> to vector<8x256xbf16>
    %cst_17 = arith.constant dense<0.000000e+00> : vector<8x128xf32>
    %48 = tpu.matmul %47, %41, %cst_17 {dimension_numbers = #tpu.dot_dimension_numbers<[1], [0], [0], [1], [0, 0, 1, 1], [], []>} : vector<8x256xbf16>, vector<256x128xbf16>, vector<8x128xf32> -> vector<8x128xf32>
    %c1_18 = arith.constant 1 : index
    %49 = memref.load %arg1[%c1_18] : memref<2xf32, #tpu.memory_space<smem>>
    %50 = vector.broadcast %49 : f32 to vector<8x128xf32>
    %51 = arith.mulf %48, %50 : vector<8x128xf32>
    %52 = tpu.concatenate %46, %51 in 1 : vector<8x128xf32>, vector<8x128xf32> -> vector<8x256xf32>
    %c0_19 = arith.constant 0 : index
    %c256 = arith.constant 256 : index
    %53 = vector.load %arg4[%c0_19, %c256] : memref<8x272xf32, #tpu.memory_space<vmem>>, vector<8x1xf32>
    %54 = vector.broadcast %53 : vector<8x1xf32> to vector<8x256xf32>
    %55 = arith.addf %52, %54 : vector<8x256xf32>
    %c0_20 = arith.constant 0 : index
    %c512 = arith.constant 512 : index
    %56 = vector.load %arg3[%c0_20, %c512] : memref<9x768xf32, #tpu.memory_space<vmem>>, vector<1x256xf32>
    %c17_i32_21 = arith.constant 17 : i32
    %57 = tpu.dynamic_rotate %55 by %c17_i32_21 dim 1 : vector<8x256xf32>, i32 -> vector<8x256xf32>
    %58 = vector.broadcast %56 : vector<1x256xf32> to vector<8x256xf32>
    %59 = arith.mulf %57, %58 : vector<8x256xf32>
    %c1_22 = arith.constant 1 : index
    %c512_23 = arith.constant 512 : index
    %60 = vector.load %arg3[%c1_22, %c512_23] : memref<9x768xf32, #tpu.memory_space<vmem>>, vector<1x256xf32>
    %c16_i32_24 = arith.constant 16 : i32
    %61 = tpu.dynamic_rotate %55 by %c16_i32_24 dim 1 : vector<8x256xf32>, i32 -> vector<8x256xf32>
    %62 = vector.broadcast %60 : vector<1x256xf32> to vector<8x256xf32>
    %63 = arith.mulf %61, %62 : vector<8x256xf32>
    %c2_25 = arith.constant 2 : index
    %c512_26 = arith.constant 512 : index
    %64 = vector.load %arg3[%c2_25, %c512_26] : memref<9x768xf32, #tpu.memory_space<vmem>>, vector<1x256xf32>
    %c15_i32_27 = arith.constant 15 : i32
    %65 = tpu.dynamic_rotate %55 by %c15_i32_27 dim 1 : vector<8x256xf32>, i32 -> vector<8x256xf32>
    %66 = vector.broadcast %64 : vector<1x256xf32> to vector<8x256xf32>
    %67 = arith.mulf %65, %66 : vector<8x256xf32>
    %c3_28 = arith.constant 3 : index
    %c512_29 = arith.constant 512 : index
    %68 = vector.load %arg3[%c3_28, %c512_29] : memref<9x768xf32, #tpu.memory_space<vmem>>, vector<1x256xf32>
    %c1_i32_30 = arith.constant 1 : i32
    %69 = tpu.dynamic_rotate %55 by %c1_i32_30 dim 1 : vector<8x256xf32>, i32 -> vector<8x256xf32>
    %70 = vector.broadcast %68 : vector<1x256xf32> to vector<8x256xf32>
    %71 = arith.mulf %69, %70 : vector<8x256xf32>
    %c5_31 = arith.constant 5 : index
    %c512_32 = arith.constant 512 : index
    %72 = vector.load %arg3[%c5_31, %c512_32] : memref<9x768xf32, #tpu.memory_space<vmem>>, vector<1x256xf32>
    %c255_i32 = arith.constant 255 : i32
    %73 = tpu.dynamic_rotate %55 by %c255_i32 dim 1 : vector<8x256xf32>, i32 -> vector<8x256xf32>
    %74 = vector.broadcast %72 : vector<1x256xf32> to vector<8x256xf32>
    %75 = arith.mulf %73, %74 : vector<8x256xf32>
    %c6_33 = arith.constant 6 : index
    %c512_34 = arith.constant 512 : index
    %76 = vector.load %arg3[%c6_33, %c512_34] : memref<9x768xf32, #tpu.memory_space<vmem>>, vector<1x256xf32>
    %c241_i32 = arith.constant 241 : i32
    %77 = tpu.dynamic_rotate %55 by %c241_i32 dim 1 : vector<8x256xf32>, i32 -> vector<8x256xf32>
    %78 = vector.broadcast %76 : vector<1x256xf32> to vector<8x256xf32>
    %79 = arith.mulf %77, %78 : vector<8x256xf32>
    %c7_35 = arith.constant 7 : index
    %c512_36 = arith.constant 512 : index
    %80 = vector.load %arg3[%c7_35, %c512_36] : memref<9x768xf32, #tpu.memory_space<vmem>>, vector<1x256xf32>
    %c240_i32 = arith.constant 240 : i32
    %81 = tpu.dynamic_rotate %55 by %c240_i32 dim 1 : vector<8x256xf32>, i32 -> vector<8x256xf32>
    %82 = vector.broadcast %80 : vector<1x256xf32> to vector<8x256xf32>
    %83 = arith.mulf %81, %82 : vector<8x256xf32>
    %c8_37 = arith.constant 8 : index
    %c512_38 = arith.constant 512 : index
    %84 = vector.load %arg3[%c8_37, %c512_38] : memref<9x768xf32, #tpu.memory_space<vmem>>, vector<1x256xf32>
    %c239_i32 = arith.constant 239 : i32
    %85 = tpu.dynamic_rotate %55 by %c239_i32 dim 1 : vector<8x256xf32>, i32 -> vector<8x256xf32>
    %86 = vector.broadcast %84 : vector<1x256xf32> to vector<8x256xf32>
    %87 = arith.mulf %85, %86 : vector<8x256xf32>
    %88 = tpu.concatenate %59, %63, %67, %71, %55, %75, %79, %83, %87 in 0 : vector<8x256xf32>, vector<8x256xf32>, vector<8x256xf32>, vector<8x256xf32>, vector<8x256xf32>, vector<8x256xf32>, vector<8x256xf32>, vector<8x256xf32>, vector<8x256xf32> -> vector<72x256xf32>
    %89 = arith.truncf %88 : vector<72x256xf32> to vector<72x256xbf16>
    %c0_39 = arith.constant 0 : index
    %c128 = arith.constant 128 : index
    %90 = vector.load %arg4[%c0_39, %c128] : memref<8x272xf32, #tpu.memory_space<vmem>>, vector<8x72xf32>
    %91 = arith.truncf %90 : vector<8x72xf32> to vector<8x72xbf16>
    %cst_40 = arith.constant dense<0.000000e+00> : vector<8x256xf32>
    %92 = tpu.matmul %91, %89, %cst_40 {dimension_numbers = #tpu.dot_dimension_numbers<[1], [0], [0], [1], [0, 0, 1, 1], [], []>} : vector<8x72xbf16>, vector<72x256xbf16>, vector<8x256xf32> -> vector<8x256xf32>
    %c0_41 = arith.constant 0 : index
    %c257 = arith.constant 257 : index
    %93 = vector.load %arg4[%c0_41, %c257] : memref<8x272xf32, #tpu.memory_space<vmem>>, vector<8x1xf32>
    %94 = vector.broadcast %93 : vector<8x1xf32> to vector<8x256xf32>
    %95 = arith.addf %92, %94 : vector<8x256xf32>
    %cst_42 = arith.constant 0.000000e+00 : f32
    %96 = vector.broadcast %cst_42 : f32 to vector<8x256xf32>
    %97 = arith.maximumf %95, %96 : vector<8x256xf32>
    %c0_43 = arith.constant 0 : index
    %c264 = arith.constant 264 : index
    %98 = vector.load %arg4[%c0_43, %c264] : memref<8x272xf32, #tpu.memory_space<vmem>>, vector<8x8xf32>
    %cst_44 = arith.constant dense<0.000000e+00> : vector<8x256xf32>
    %99 = tpu.matmul %98, %97, %cst_44 {dimension_numbers = #tpu.dot_dimension_numbers<[1], [0], [0], [1], [0, 0, 1, 1], [], []>} : vector<8x8xf32>, vector<8x256xf32>, vector<8x256xf32> -> vector<8x256xf32>
    %c0_45 = arith.constant 0 : index
    %c258 = arith.constant 258 : index
    %100 = vector.load %arg4[%c0_45, %c258] : memref<8x272xf32, #tpu.memory_space<vmem>>, vector<8x1xf32>
    %101 = vector.broadcast %100 : vector<8x1xf32> to vector<8x256xf32>
    %102 = arith.addf %99, %101 : vector<8x256xf32>
    %c0_46 = arith.constant 0 : index
    %c0_47 = arith.constant 0 : index
    %103 = vector.load %arg6[%c0_46, %c0_47] : memref<8x256xf32, #tpu.memory_space<vmem>>, vector<8x256xf32>
    tpu.vector_store %arg6[%c0_46, %c0_47], %102 {strides = array<i32>} : memref<8x256xf32, #tpu.memory_space<vmem>>, vector<8x256xf32>,
    return
  }
  func.func @transform_0(%arg0: i32) -> i32 {
    %c0_i32 = arith.constant 0 : i32
    %c0_i32_0 = arith.constant 0 : i32
    return %c0_i32 : i32
  }
  func.func @transform_1(%arg0: i32) -> (i32, i32) {
    %c0_i32 = arith.constant 0 : i32
    %c0_i32_0 = arith.constant 0 : i32
    %c0_i32_1 = arith.constant 0 : i32
    return %c0_i32, %c0_i32_0 : i32, i32
  }
  func.func @transform_2(%arg0: i32) -> (i32, i32) {
    %c0_i32 = arith.constant 0 : i32
    %c0_i32_0 = arith.constant 0 : i32
    %c0_i32_1 = arith.constant 0 : i32
    return %c0_i32, %c0_i32_0 : i32, i32
  }
  func.func @transform_3(%arg0: i32) -> (i32, i32) {
    %c0_i32 = arith.constant 0 : i32
    %c0_i32_0 = arith.constant 0 : i32
    %c0_i32_1 = arith.constant 0 : i32
    return %c0_i32, %c0_i32_0 : i32, i32
  }
  func.func @transform_4(%arg0: i32) -> (i32, i32) {
    %c0_i32 = arith.constant 0 : i32
    %c0_i32_0 = arith.constant 0 : i32
    %c0_i32_1 = arith.constant 0 : i32
    return %c0_i32, %c0_i32_0 : i32, i32
  }
  func.func @transform_5(%arg0: i32) -> (i32, i32) {
    %c0_i32 = arith.constant 0 : i32
    %c0_i32_0 = arith.constant 0 : i32
    %c0_i32_1 = arith.constant 0 : i32
    return %c0_i32, %c0_i32_0 : i32, i32
  }
}

</mosaic_0001>

<bundles_post_ra>
// kernel: pyramid_occupancy_forward.1
= control target key start
LH: loop header
LB: loop body
LE: loop exit
PB: predicated region body
PF: predicated region fallthrough
CT: control target
= control target key end

     0   :  { %10 = vsyncpa [#allocation3], 0  ;;  %s1629_s0 = inlined_call_operand.vmem [shape: f32[2], index: 0, kind: input, shape index: {}]   ;;  %s1630_s1 = inlined_call_operand.vmem [shape: f32[8,512], index: 1, kind: input, shape index: {}]   ;;  %s1631_s2 = inlined_call_operand.vmem [shape: f32[9,768], index: 2, kind: input, shape index: {}]   ;;  %s1632_s3 = inlined_call_operand.vmem [shape: f32[8,272], index: 3, kind: input, shape index: {}]   ;;  %s1633_s4 = inlined_call_operand.vmem [shape: bf16[256,128], index: 4, kind: input, shape index: {}]   ;;  %s1634_s5 = inlined_call_operand.vmem [shape: f32[8,256], index: 5, kind: output, shape index: {}]  }
   0x1   :  { %s17_s20 = sshll.u32 %s1629_s0, 4  ;;  %s18_s20 = int_to_ptr.vmem [resolvable:$true] %s17_s20 }
   0x2   :  { %s1150_s21 = scalar_lea.vmem %s18_s20, 16  ;;  %p1155_p1 = scmp.lt.s32.totalorder %s18_s20, %s18_s20 }
   0x3   :  { %p1151_p0 = scmp.ne.s32.totalorder %s18_s20, %s1150_s21  ;;  %p1156_p2 = scmp.lt.s32.totalorder %s1150_s21, %s1150_s21 }
   0x5   :  { %p1157_p3 = por %p1156_p2, %p1155_p1 }
   0x7   :  { %p1158_p4 = pnand %p1157_p3, %p1151_p0 }
   0x9   :  { %1161 = shalt.err (!%p1158_p4)
}
   0xa   :  { %s1164_s22 = smov [#allocation2]  }
   0xb   :  { %20 = dma.vmem_to_smem %s18_s20, 16, %s1164_s22, [#allocation3]  }
   0xc   :  { %1162 = dma.done.wait [#allocation3], 16  }
   0xd   :  { %1163 = vsyncadd [#allocation3], 4294967280 }
   0xe   :  { %32 = sfence }
   0xf   :  { %v1214_v0 = vld [vmem:[%s1630_s1 + $0x10] sm:$0xff]  ;;  %v1219_v1 = vld [vmem:[%s1630_s1] sm:$0xff]  ;;  %s1165_s26 = smov 17   ;;  %v1228_v2 = vld [vmem:[%s1630_s1 + $0x18] sm:$0xff]  ;;  %s1166_s6 = smov 16   ;;  %v1172_v4 = vmov 0   ;;  %v47_v5 = vlaneseq }
  0x10   :  { %43 = vrot.lane.b32.xlu1 %v1214_v0, %s1165_s26  ;;  %39 = vrot.lane.b32.xlu0 %v1219_v1, %s1165_s26  ;;  %v1233_v3 = vld [vmem:[%s1630_s1 + $0x8] sm:$0xff]  ;;  %s1167_s1 = smov 15   ;;  %s1168_s7 = smov 1   ;;  %vm385_vm8 = vcmask 1043456   ;;  %vm381_vm9 = vcmask 588800   ;;  %vm952_vm10 = vcmask 64512  }
  0x11   :  { %s1169_s8 = smov 127   ;;  %s1170_s9 = smov 113   ;;  %430 = vmatprep.mubr.bf16.mxu0 %v1172_v4  ;;  %471 = vmatprep.mubr.bf16.mxu1 %v1172_v4  ;;  %v56_v6 = vshrl.u32 %v47_v5, 7  ;;  %v1298_v9 = vand.u32 127, %v47_v5 }
  0x12   :  { %s1171_s10 = smov 112   ;;  %1130 = vset.pattern.permute.xlu0 %v1172_v4  ;;  %s1173_s11 = smov 111   ;;  %v38_v11 = vld [vmem:[%s1631_s2] ss:$8 sm:$0xf] }
  0x13   :  { %v1300_v10 = vsub.s32 1, %v56_v6  ;;  %v1033_v12 = vld [vmem:[%s1631_s2 + $0x1] ss:$8 sm:$0xf]  ;;  %vm49_vm0 = vcmp.lt.s32.totalorder %v1298_v9, 17  ;;  %v1309_v13 = vsub.s32 0, %v56_v6 }
  0x14   :  { %45 = vrot.lane.b32.xlu1 %v1228_v2, %s1165_s26  ;;  %41 = vrot.lane.b32.xlu0 %v1233_v3, %s1165_s26  ;;  %v1311_v15 = vsub.s32 2, %v56_v6  ;;  %v1313_v17 = vsub.s32 3, %v56_v6  ;;  %vm89_vm1 = vcmp.lt.s32.totalorder %v1298_v9, 16  ;;  %v1034_v52 = vld [vmem:[%s1631_s2 + $0x2] ss:$8 sm:$0xf] }
  0x15   :  { %v62_v18 = vrot.slane %v38_v11, %v1300_v10  ;;  %v102_v19 = vrot.slane %v1033_v12, %v1300_v10  ;;  %v58_v21 = vrot.slane %v38_v11, %v1309_v13  ;;  %v98_v25 = vrot.slane %v1033_v12, %v1309_v13  ;;  %v1035_v53 = vld [vmem:[%s1631_s2 + $0x3] ss:$8 sm:$0xf]  ;;  %s1060_s0 = sld [smem:[#allocation2 + $0x1]] }
  0x16   :  { %v66_v22 = vrot.slane %v38_v11, %v1311_v15  ;;  %v106_v28 = vrot.slane %v1033_v12, %v1311_v15  ;;  %v70_v29 = vrot.slane %v38_v11, %v1313_v17  ;;  %v110_v33 = vrot.slane %v1033_v12, %v1313_v17 }
  0x17   :  { %vm129_vm2 = vcmp.lt.s32.totalorder %v1298_v9, 15  ;;  %v142_v56 = vrot.slane %v1034_v52, %v1300_v10  ;;  %vm169_vm3 = vcmp.lt.s32.totalorder %v1298_v9, 1  ;;  %v182_v57 = vrot.slane %v1035_v53, %v1300_v10 }
  0x18   :  { %83 = vrot.lane.b32.xlu1 %v1233_v3, %s1166_s6  ;;  %81 = vrot.lane.b32.xlu0 %v1219_v1, %s1166_s6  ;;  %v138_v59 = vrot.slane %v1034_v52, %v1309_v13  ;;  %v146_v60 = vrot.slane %v1034_v52, %v1311_v15  ;;  %v150_v61 = vrot.slane %v1034_v52, %v1313_v17  ;;  %vm209_vm4 = vcmp.lt.s32.totalorder %v1298_v9, 127 }
  0x19   :  { %vm289_vm5 = vcmp.lt.s32.totalorder %v1298_v9, 112  ;;  %vm249_vm6 = vcmp.lt.s32.totalorder %v1298_v9, 113  ;;  %vm329_vm7 = vcmp.lt.s32.totalorder %v1298_v9, 111  ;;  %v1176_v9 = vmov 0.0  }
  0x1c   :  { %87 = vrot.lane.b32.xlu1 %v1228_v2, %s1166_s6  ;;  %85 = vrot.lane.b32.xlu0 %v1214_v0, %s1166_s6 }
  0x20   :  { %123 = vrot.lane.b32.xlu1 %v1233_v3, %s1167_s1  ;;  %121 = vrot.lane.b32.xlu0 %v1219_v1, %s1167_s1 }
  0x24   :  { %127 = vrot.lane.b32.xlu1 %v1228_v2, %s1167_s1  ;;  %125 = vrot.lane.b32.xlu0 %v1214_v0, %s1167_s1 }
  0x28   :  { %163 = vrot.lane.b32.xlu1 %v1233_v3, %s1168_s7  ;;  %161 = vrot.lane.b32.xlu0 %v1219_v1, %s1168_s7 }
  0x2c   :  { %167 = vrot.lane.b32.xlu1 %v1228_v2, %s1168_s7  ;;  %165 = vrot.lane.b32.xlu0 %v1214_v0, %s1168_s7 }
  0x30   :  { %203 = vrot.lane.b32.xlu1 %v1233_v3, %s1169_s8  ;;  %201 = vrot.lane.b32.xlu0 %v1219_v1, %s1169_s8 }
  0x34   :  { %207 = vrot.lane.b32.xlu1 %v1228_v2, %s1169_s8  ;;  %205 = vrot.lane.b32.xlu0 %v1214_v0, %s1169_s8 }
  0x38   :  { %243 = vrot.lane.b32.xlu1 %v1233_v3, %s1170_s9  ;;  %241 = vrot.lane.b32.xlu0 %v1219_v1, %s1170_s9 }
  0x3c   :  { %247 = vrot.lane.b32.xlu1 %v1228_v2, %s1170_s9  ;;  %245 = vrot.lane.b32.xlu0 %v1214_v0, %s1170_s9 }
  0x40   :  { %283 = vrot.lane.b32.xlu1 %v1233_v3, %s1171_s10  ;;  %281 = vrot.lane.b32.xlu0 %v1219_v1, %s1171_s10 }
  0x44   :  { %287 = vrot.lane.b32.xlu1 %v1228_v2, %s1171_s10  ;;  %285 = vrot.lane.b32.xlu0 %v1214_v0, %s1171_s10 }
  0x48   :  { %323 = vrot.lane.b32.xlu1 %v1233_v3, %s1173_s11  ;;  %321 = vrot.lane.b32.xlu0 %v1219_v1, %s1173_s11 }
  0x4c   :  { %327 = vrot.lane.b32.xlu1 %v1228_v2, %s1173_s11  ;;  %325 = vrot.lane.b32.xlu0 %v1214_v0, %s1173_s11 }
  0x82   :  { %v44_v7 = vpop.permute.xlu1 %43  ;;  %v40_v8 = vpop.permute.xlu0 %39 }
  0x86   :  { %v46_v14 = vpop.permute.xlu1 %45  ;;  %v42_v16 = vpop.permute.xlu0 %41 }
  0x87   :  { %v52_v20 = vsel %vm49_vm0, %v40_v8, %v42_v16  ;;  %v53_v26 = vsel %vm49_vm0, %v46_v14, %v40_v8  ;;  %v51_v30 = vsel %vm49_vm0, %v42_v16, %v44_v7  ;;  %v50_v34 = vsel %vm49_vm0, %v44_v7, %v46_v14 }
  0x88   :  { %v76_v31 = vmul.f32 %v62_v18, %v52_v20  ;;  %v75_v35 = vmul.f32 %v58_v21, %v53_v26  ;;  %v77_v39 = vmul.f32 %v66_v22, %v51_v30  ;;  %v78_v45 = vmul.f32 %v70_v29, %v50_v34 }
  0x89   :  { %v178_v7 = vrot.slane %v1035_v53, %v1309_v13  ;;  %v186_v8 = vrot.slane %v1035_v53, %v1311_v15  ;;  %v190_v16 = vrot.slane %v1035_v53, %v1313_v17 }
  0x8a   :  { %v84_v23 = vpop.permute.xlu1 %83  ;;  %v82_v24 = vpop.permute.xlu0 %81 }
  0x8b   :  { %v92_v27 = vsel %vm89_vm1, %v82_v24, %v84_v23 }
  0x8c   :  { %v116_v32 = vmul.f32 %v102_v19, %v92_v27 }
  0x8e   :  { %v88_v36 = vpop.permute.xlu1 %87  ;;  %v86_v37 = vpop.permute.xlu0 %85  ;;  %v360_v38 = vpack.c.bf16 %v116_v32, %v76_v31  ;;  %v1036_v31 = vld [vmem:[%s1631_s2 + $0x5] ss:$8 sm:$0xf] }
  0x8f   :  { %v93_v40 = vsel %vm89_vm1, %v88_v36, %v82_v24  ;;  %v90_v41 = vsel %vm89_vm1, %v86_v37, %v88_v36  ;;  %v91_v42 = vsel %vm89_vm1, %v84_v23, %v86_v37  ;;  %v218_v37 = vrot.slane %v1036_v31, %v1309_v13 }
  0x90   :  { %v115_v43 = vmul.f32 %v98_v25, %v93_v40  ;;  %v117_v44 = vmul.f32 %v106_v28, %v91_v42  ;;  %398 = vmatprep.subr.bf16.mxu0 %v360_v38  ;;  %v118_v46 = vmul.f32 %v110_v33, %v90_v41  ;;  %v230_v38 = vrot.slane %v1036_v31, %v1313_v17 }
  0x91   :  { %v222_v40 = vrot.slane %v1036_v31, %v1300_v10  ;;  %v226_v41 = vrot.slane %v1036_v31, %v1311_v15 }
  0x92   :  { %v124_v47 = vpop.permute.xlu1 %123  ;;  %v122_v48 = vpop.permute.xlu0 %121  ;;  %v359_v49 = vpack.c.bf16 %v115_v43, %v75_v35  ;;  %v362_v50 = vpack.c.bf16 %v118_v46, %v78_v45  ;;  %v361_v51 = vpack.c.bf16 %v117_v44, %v77_v39 }
  0x93   :  { %v132_v58 = vsel %vm129_vm2, %v122_v48, %v124_v47 }
  0x94   :  { %399 = vmatpush1.bf16.msra.mxu0 %v359_v49  ;;  %439 = vmatprep.subr.bf16.mxu1 %v362_v50  ;;  %v156_v11 = vmul.f32 %v142_v56, %v132_v58 }
  0x95   :  { %440 = vmatpush1.bf16.msra.mxu1 %v361_v51 }
  0x96   :  { %v128_v54 = vpop.permute.xlu1 %127  ;;  %v126_v55 = vpop.permute.xlu0 %125 }
  0x97   :  { %v133_v5 = vsel %vm129_vm2, %v128_v54, %v122_v48  ;;  %v131_v12 = vsel %vm129_vm2, %v124_v47, %v126_v55  ;;  %v130_v18 = vsel %vm129_vm2, %v126_v55, %v128_v54 }
  0x98   :  { %v155_v19 = vmul.f32 %v138_v59, %v133_v5  ;;  %v157_v23 = vmul.f32 %v146_v60, %v131_v12  ;;  %v158_v27 = vmul.f32 %v150_v61, %v130_v18  ;;  %v1038_v59 = vld [vmem:[%s1631_s2 + $0x7] ss:$8 sm:$0xf] }
  0x99   :  { %v298_v5 = vrot.slane %v1038_v59, %v1309_v13  ;;  %v306_v12 = vrot.slane %v1038_v59, %v1311_v15 }
  0x9a   :  { %v164_v62 = vpop.permute.xlu1 %163  ;;  %v162_v63 = vpop.permute.xlu0 %161 }
  0x9b   :  { %v172_v6 = vsel %vm169_vm3, %v162_v63, %v164_v62 }
  0x9c   :  { %v196_v14 = vmul.f32 %v182_v57, %v172_v6  ;;  %v1039_v6 = vld [vmem:[%s1631_s2 + $0x30] ss:$8 sm:$0xf] }
  0x9e   :  { %v168_v20 = vpop.permute.xlu1 %167  ;;  %v166_v21 = vpop.permute.xlu0 %165  ;;  %v364_v22 = vpack.c.bf16 %v196_v14, %v156_v11  ;;  %v302_v11 = vrot.slane %v1038_v59, %v1300_v10 }
  0x9f   :  { %v173_v24 = vsel %vm169_vm3, %v168_v20, %v162_v63  ;;  %v170_v25 = vsel %vm169_vm3, %v166_v21, %v168_v20  ;;  %v171_v26 = vsel %vm169_vm3, %v164_v62, %v166_v21 }
  0xa0   :  { %v195_v28 = vmul.f32 %v178_v7, %v173_v24  ;;  %v197_v29 = vmul.f32 %v186_v8, %v171_v26  ;;  %v198_v30 = vmul.f32 %v190_v16, %v170_v25  ;;  %400 = vmatprep.subr.bf16.mxu0 %v364_v22  ;;  %v310_v8 = vrot.slane %v1038_v59, %v1313_v17  ;;  %v1135_v59 = vld [vmem:[%s1633_s4] sm:$0xff]  }
  0xa2   :  { %v204_v32 = vpop.permute.xlu1 %203  ;;  %v202_v33 = vpop.permute.xlu0 %201  ;;  %v363_v34 = vpack.c.bf16 %v195_v28, %v155_v19  ;;  %v366_v35 = vpack.c.bf16 %v198_v30, %v158_v27  ;;  %v365_v36 = vpack.c.bf16 %v197_v29, %v157_v23  ;;  %v338_v23 = vrot.slane %v1039_v6, %v1309_v13 }
  0xa3   :  { %v212_v39 = vsel %vm209_vm4, %v202_v33, %v204_v32 }
  0xa4   :  { %401 = vmatpush1.bf16.msra.mxu0 %v363_v34  ;;  %441 = vmatprep.subr.bf16.mxu1 %v366_v35  ;;  %v235_v44 = vmul.f32 %v218_v37, %v212_v39 }
  0xa5   :  { %442 = vmatpush1.bf16.msra.mxu1 %v365_v36 }
  0xa6   :  { %v208_v42 = vpop.permute.xlu1 %207  ;;  %v206_v43 = vpop.permute.xlu0 %205  ;;  %v367_v56 = vpack.c.bf16 %v235_v44, %v1219_v1 }
  0xa7   :  { %v213_v45 = vsel %vm209_vm4, %v208_v42, %v202_v33  ;;  %v210_v46 = vsel %vm209_vm4, %v206_v43, %v208_v42  ;;  %v211_v47 = vsel %vm209_vm4, %v204_v32, %v206_v43  ;;  %v342_v42 = vrot.slane %v1039_v6, %v1300_v10 }
  0xa8   :  { %v238_v48 = vmul.f32 %v230_v38, %v213_v45  ;;  %v236_v49 = vmul.f32 %v222_v40, %v211_v47  ;;  %v237_v50 = vmul.f32 %v226_v41, %v210_v46  ;;  %v350_v40 = vrot.slane %v1039_v6, %v1313_v17 }
  0xa9   :  { %v346_v43 = vrot.slane %v1039_v6, %v1311_v15  ;;  %v1145_v6 = vld [vmem:[%s1633_s4 + $0x28] sm:$0xff]  }
  0xaa   :  { %v244_v51 = vpop.permute.xlu1 %243  ;;  %v242_v52 = vpop.permute.xlu0 %241  ;;  %v368_v53 = vpack.c.bf16 %v236_v49, %v1233_v3  ;;  %v370_v54 = vpack.c.bf16 %v238_v48, %v1228_v2  ;;  %v369_v55 = vpack.c.bf16 %v237_v50, %v1214_v0  ;;  %v1037_v3 = vld [vmem:[%s1631_s2 + $0x6] ss:$8 sm:$0xf] }
  0xab   :  { %v270_v0 = vrot.slane %v1037_v3, %v1313_v17  ;;  %v262_v1 = vrot.slane %v1037_v3, %v1300_v10  ;;  %v266_v62 = vrot.slane %v1037_v3, %v1311_v15  ;;  %v258_v14 = vrot.slane %v1037_v3, %v1309_v13  ;;  %v379_v15 = vld [vmem:[%s1632_s3] sm:$0xff]  ;;  %v1136_v3 = vld [vmem:[%s1633_s4 + $0x48] sm:$0xff]  }
  0xac   :  { %402 = vmatprep.subr.bf16.mxu0 %v368_v53  ;;  %443 = vmatprep.subr.bf16.mxu1 %v370_v54  ;;  %v252_v18 = vsel %vm249_vm6, %v242_v52, %v244_v51 }
  0xad   :  { %403 = vmatpush1.bf16.msra.mxu0 %v367_v56  ;;  %444 = vmatpush1.bf16.msra.mxu1 %v369_v55  ;;  %v275_v32 = vmul.f32 %v258_v14, %v252_v18  ;;  %v1134_v55 = vld [vmem:[%s1633_s4 + $0x40] sm:$0xff]   ;;  %v1500_v14 = vld [vmem:[%s1632_s3 + $0x10] sm:$0xff] }
  0xae   :  { %v248_v57 = vpop.permute.xlu1 %247  ;;  %v246_v58 = vpop.permute.xlu0 %245  ;;  %705 = vperm.xlu0 %1130, %v1500_v14  }
  0xaf   :  { %v253_v61 = vsel %vm249_vm6, %v248_v57, %v242_v52  ;;  %v251_v63 = vsel %vm249_vm6, %v244_v51, %v246_v58  ;;  %v250_v16 = vsel %vm249_vm6, %v246_v58, %v248_v57  ;;  %v380_v58 = vpack.c.bf16 %v379_v15, %v379_v15  ;;  %v1062_v15 = vld [vmem:[%s1631_s2 + $0x21] ss:$8 sm:$0x3] }
  0xb0   :  { %v278_v19 = vmul.f32 %v270_v0, %v253_v61  ;;  %v276_v20 = vmul.f32 %v262_v1, %v251_v63  ;;  %v277_v28 = vmul.f32 %v266_v62, %v250_v16  ;;  %v1137_v0 = vld [vmem:[%s1633_s4 + $0x8] sm:$0xff]   ;;  %v1138_v1 = vld [vmem:[%s1633_s4 + $0x50] sm:$0xff]   ;;  %v1141_v61 = vld [vmem:[%s1633_s4 + $0x18] sm:$0xff]  }
  0xb1   :  { %v1142_v62 = vld [vmem:[%s1633_s4 + $0x60] sm:$0xff]  }
  0xb2   :  { %v284_v2 = vpop.permute.xlu1 %283  ;;  %v282_v60 = vpop.permute.xlu0 %281  ;;  %v1143_v63 = vld [vmem:[%s1633_s4 + $0x20] sm:$0xff]  }
  0xb3   :  { %v292_v7 = vsel %vm289_vm5, %v282_v60, %v284_v2 }
  0xb4   :  { %v315_v24 = vmul.f32 %v298_v5, %v292_v7  ;;  %v1144_v5 = vld [vmem:[%s1633_s4 + $0x68] sm:$0xff]   ;;  %v1146_v7 = vld [vmem:[%s1633_s4 + $0x70] sm:$0xff]  }
  0xb6   :  { %v288_v21 = vpop.permute.xlu1 %287  ;;  %v286_v22 = vpop.permute.xlu0 %285  ;;  %v371_v39 = vpack.c.bf16 %v315_v24, %v275_v32 }
  0xb7   :  { %v293_v25 = vsel %vm289_vm5, %v288_v21, %v282_v60  ;;  %v290_v26 = vsel %vm289_vm5, %v286_v22, %v288_v21  ;;  %v291_v27 = vsel %vm289_vm5, %v284_v2, %v286_v22  ;;  %v1139_v2 = vld [vmem:[%s1633_s4 + $0x10] sm:$0xff]   ;;  %v1140_v60 = vld [vmem:[%s1633_s4 + $0x58] sm:$0xff]  }
  0xb8   :  { %v318_v29 = vmul.f32 %v310_v8, %v293_v25  ;;  %v316_v30 = vmul.f32 %v302_v11, %v291_v27  ;;  %v317_v31 = vmul.f32 %v306_v12, %v290_v26  ;;  %v1147_v8 = vld [vmem:[%s1633_s4 + $0x30] sm:$0xff]   ;;  %v1148_v11 = vld [vmem:[%s1633_s4 + $0x78] sm:$0xff]  }
  0xb9   :  { %v1149_v12 = vld [vmem:[%s1633_s4 + $0x38] sm:$0xff]   ;;  %s656_s4 = sld [smem:[#allocation2]] }
  0xba   :  { %v324_v33 = vpop.permute.xlu1 %323  ;;  %v322_v34 = vpop.permute.xlu0 %321  ;;  %v372_v35 = vpack.c.bf16 %v316_v30, %v276_v20  ;;  %v374_v36 = vpack.c.bf16 %v318_v29, %v278_v19  ;;  %v373_v37 = vpack.c.bf16 %v317_v31, %v277_v28 }
  0xbb   :  { %v332_v38 = vsel %vm329_vm7, %v322_v34, %v324_v33 }
  0xbc   :  { %v355_v41 = vmul.f32 %v338_v23, %v332_v38  ;;  %404 = vmatprep.subr.bf16.mxu0 %v372_v35  ;;  %445 = vmatprep.subr.bf16.mxu1 %v374_v36 }
  0xbd   :  { %405 = vmatpush1.bf16.msra.mxu0 %v371_v39  ;;  %446 = vmatpush1.bf16.msra.mxu1 %v373_v37 }
  0xbe   :  { %v328_v44 = vpop.permute.xlu1 %327  ;;  %v326_v45 = vpop.permute.xlu0 %325  ;;  %v375_v48 = vpack.c.bf16 %v355_v41, %v355_v41 }
  0xbf   :  { %v333_v46 = vsel %vm329_vm7, %v328_v44, %v322_v34  ;;  %v330_v47 = vsel %vm329_vm7, %v326_v45, %v328_v44  ;;  %v331_v17 = vsel %vm329_vm7, %v324_v33, %v326_v45  ;;  %v657_v37 = vstv %s656_s4 }
  0xc0   :  { %v358_v49 = vmul.f32 %v350_v40, %v333_v46  ;;  %v356_v50 = vmul.f32 %v342_v42, %v331_v17  ;;  %v357_v51 = vmul.f32 %v346_v43, %v330_v47  ;;  %v387_v56 = vsel %vm385_vm8, %v375_v48, 0 }
  0xc1   :  { %v700_v43 = vstv %s1060_s0  ;;  %v1174_v48 = vmov 1  }
  0xc2   :  { %v378_v52 = vpack.c.bf16 %v358_v49, %v358_v49  ;;  %v376_v53 = vpack.c.bf16 %v356_v50, %v356_v50  ;;  %v377_v54 = vpack.c.bf16 %v357_v51, %v357_v51  ;;  %1131 = vset.pattern.permute.xlu0 %v1174_v48  ;;  %v1061_v51 = vld [vmem:[%s1631_s2 + $0x20] ss:$8 sm:$0x3] }
  0xc4   :  { %1040 = vmatprep.subr.msk.bf16.mxu0 %vm385_vm8, %v376_v53  ;;  %1042 = vmatprep.subr.msk.bf16.mxu1 %vm385_vm8, %v378_v52  ;;  %v393_v57 = vsel %vm385_vm8, %v377_v54, 0  ;;  %v722_v54 = vrot.slane %v1061_v51, %v1309_v13 }
  0xc5   :  { %407 = vmatpush1.bf16.msra.mxu0 %v387_v56  ;;  %448 = vmatpush1.bf16.msra.mxu1 %v393_v57  ;;  %v743_v56 = vrot.slane %v1062_v15, %v1309_v13  ;;  %v747_v57 = vrot.slane %v1062_v15, %v1300_v10 }
  0xc6   :  { %1072 = vmatprep.subr.bf16.mxu0 %v1134_v55  ;;  %1094 = vmatprep.subr.bf16.mxu1 %v1134_v55  ;;  %v726_v55 = vrot.slane %v1061_v51, %v1300_v10  ;;  %v1068_v51 = vld [vmem:[%s1631_s2 + $0x50] ss:$8 sm:$0x3] }
  0xc8   :  { %1041 = vmatmul.mubr.msk.bf16.vlgmr.msra.gmra.mrb[0].mxu0 %vm381_vm9, %v380_v58  ;;  %1043 = vmatmul.mubr.msk.bf16.vlgmr.msra.gmra.mrb[0].mxu1 %vm381_vm9, %v380_v58 }
  0xc9   :  { %1073 = vmatpush3.bf16.msra.mxu0 %v1135_v59  ;;  %1095 = vmatpush3.bf16.msra.mxu1 %v1135_v59 }
  0xca   :  { %1074 = vmatprep.subr.bf16.mxu0 %v1136_v3  ;;  %1096 = vmatprep.subr.bf16.mxu1 %v1136_v3 }
  0xcd   :  { %1075 = vmatpush3.bf16.msra.mxu0 %v1137_v0  ;;  %1097 = vmatpush3.bf16.msra.mxu1 %v1137_v0 }
  0xce   :  { %1076 = vmatprep.subr.bf16.mxu0 %v1138_v1  ;;  %1098 = vmatprep.subr.bf16.mxu1 %v1138_v1 }
  0xd1   :  { %1077 = vmatpush3.bf16.msra.mxu0 %v1139_v2  ;;  %1099 = vmatpush3.bf16.msra.mxu1 %v1139_v2 }
  0xd2   :  { %1078 = vmatprep.subr.bf16.mxu0 %v1140_v60  ;;  %1100 = vmatprep.subr.bf16.mxu1 %v1140_v60 }
  0xd5   :  { %1079 = vmatpush3.bf16.msra.mxu0 %v1141_v61  ;;  %1101 = vmatpush3.bf16.msra.mxu1 %v1141_v61 }
  0xd6   :  { %1080 = vmatprep.subr.bf16.mxu0 %v1142_v62  ;;  %1102 = vmatprep.subr.bf16.mxu1 %v1142_v62 }
  0xd9   :  { %1081 = vmatpush3.bf16.msra.mxu0 %v1143_v63  ;;  %1103 = vmatpush3.bf16.msra.mxu1 %v1143_v63 }
  0xda   :  { %1082 = vmatprep.subr.bf16.mxu0 %v1144_v5  ;;  %1104 = vmatprep.subr.bf16.mxu1 %v1144_v5  ;;  %v1063_v5 = vld [vmem:[%s1631_s2 + $0x22] ss:$8 sm:$0x3] }
  0xdd   :  { %1083 = vmatpush3.bf16.msra.mxu0 %v1145_v6  ;;  %1105 = vmatpush3.bf16.msra.mxu1 %v1145_v6  ;;  %v1064_v6 = vld [vmem:[%s1631_s2 + $0x23] ss:$8 sm:$0x3] }
  0xde   :  { %1084 = vmatprep.subr.bf16.mxu0 %v1146_v7  ;;  %1106 = vmatprep.subr.bf16.mxu1 %v1146_v7 }
  0xe1   :  { %1085 = vmatpush3.bf16.msra.mxu0 %v1147_v8  ;;  %1107 = vmatpush3.bf16.msra.mxu1 %v1147_v8 }
  0xe2   :  { %1086 = vmatprep.subr.bf16.mxu0 %v1148_v11  ;;  %1108 = vmatprep.subr.bf16.mxu1 %v1148_v11 }
  0xe5   :  { %1087 = vmatpush3.bf16.msra.mxu0 %v1149_v12  ;;  %1109 = vmatpush3.bf16.msra.mxu1 %v1149_v12 }
 0x12d   :  { %v706_v33 = vpop.permute.xlu0 %705 }
 0x19b   :  { %v432_v16 = vpop.f32.mrb[0].mxu0  ;;  %v473_v18 = vpop.f32.mrb[0].mxu1 }
 0x19c   :  { %v480_v19 = vmax.f32 %v432_v16, 0.0  ;;  %v482_v20 = vmax.f32 %v473_v18, 0.0  ;;  %v434_v21 = vpop.f32.mrb[1].mxu0  ;;  %v475_v22 = vpop.f32.mrb[1].mxu1  ;;  %v764_v16 = vrot.slane %v1063_v5, %v1309_v13  ;;  %v768_v18 = vrot.slane %v1063_v5, %v1300_v10 }
 0x19d   :  { %v481_v23 = vmax.f32 %v434_v21, 0.0  ;;  %v483_v24 = vmax.f32 %v475_v22, 0.0  ;;  %v436_v25 = vpop.f32.mrb[2].mxu0  ;;  %v477_v26 = vpop.f32.mrb[2].mxu1 }
 0x19e   :  { %v486_v27 = vpack.c.bf16 %v482_v20, %v482_v20  ;;  %v437_v28 = vpop.f32.mrb[3].mxu0  ;;  %v478_v29 = vpop.f32.mrb[3].mxu1  ;;  %v484_v32 = vpack.c.bf16 %v480_v19, %v480_v19  ;;  %v785_v19 = vrot.slane %v1064_v6, %v1309_v13  ;;  %v789_v20 = vrot.slane %v1064_v6, %v1300_v10  ;;  %v1065_v21 = vld [vmem:[%s1631_s2 + $0x25] ss:$8 sm:$0x3] }
 0x19f   :  { %v485_v30 = vpack.c.bf16 %v481_v23, %v481_v23  ;;  %v487_v31 = vpack.c.bf16 %v483_v24, %v483_v24  ;;  %v810_v28 = vrot.slane %v1065_v21, %v1300_v10 }
 0x1a1   :  { %648 = vmatprep.mubr.bf16.mxu0 %v485_v30  ;;  %691 = vmatprep.mubr.bf16.mxu1 %v487_v31 }
 0x1a2   :  { %649 = vmatmul.mubr.bf16.vlgmr.msra.gmra.mrb[4].mxu0 %v484_v32  ;;  %692 = vmatmul.mubr.bf16.vlgmr.msra.gmra.mrb[4].mxu1 %v486_v27  ;;  %v806_v27 = vrot.slane %v1065_v21, %v1309_v13 }
 0x1a3   :  { %935 = vmatprep.mubr.bf16.mxu0 %v1172_v4  ;;  %1019 = vmatprep.mubr.f32.mxu1 %v1176_v9 }
 0x275   :  { %v1088_v34 = vpop.f32.mrb[4].mxu0  ;;  %v1110_v35 = vpop.f32.mrb[4].mxu1 }
 0x276   :  { %v1089_v36 = vpop.f32.mrb[5].mxu0  ;;  %v1111_v38 = vpop.f32.mrb[5].mxu1 }
 0x277   :  { %v1090_v39 = vadd.f32 %v1089_v36, %v1088_v34  ;;  %v1112_v40 = vadd.f32 %v1111_v38, %v1110_v35  ;;  %v1091_v41 = vpop.f32.mrb[6].mxu0  ;;  %v1113_v42 = vpop.f32.mrb[6].mxu1 }
 0x278   :  { %v1092_v44 = vpop.f32.mrb[7].mxu0  ;;  %v1114_v45 = vpop.f32.mrb[7].mxu1  ;;  %v1066_v41 = vld [vmem:[%s1631_s2 + $0x26] ss:$8 sm:$0x3] }
 0x279   :  { %v658_v46 = vmul.f32 %v1090_v39, %v657_v37  ;;  %v701_v47 = vmul.f32 %v1112_v40, %v700_v43  ;;  %v1067_v42 = vld [vmem:[%s1631_s2 + $0x27] ss:$8 sm:$0x3]  ;;  %v831_v48 = vrot.slane %v1066_v41, %v1300_v10 }
 0x27b   :  { %v1504_v17 = vadd.f32 %v706_v33, %v658_v46  ;;  %v1510_v4 = vadd.f32 %v706_v33, %v701_v47  ;;  %v827_v47 = vrot.slane %v1066_v41, %v1309_v13 }
 0x27d   :  { %733 = vrot.lane.b32.xlu0 %v1504_v17, %s1166_s6  ;;  %712 = vrot.lane.b32.xlu1 %v1504_v17, %s1165_s26 }
 0x281   :  { %754 = vrot.lane.b32.xlu0 %v1504_v17, %s1167_s1  ;;  %714 = vrot.lane.b32.xlu1 %v1510_v4, %s1165_s26  ;;  %s1175_s26 = smov 120  }
 0x285   :  { %775 = vrot.lane.b32.xlu0 %v1504_v17, %s1168_s7  ;;  %735 = vrot.lane.b32.xlu1 %v1510_v4, %s1166_s6 }
 0x289   :  { %796 = vrot.lane.b32.xlu0 %v1504_v17, %s1169_s8  ;;  %756 = vrot.lane.b32.xlu1 %v1510_v4, %s1167_s1 }
 0x28d   :  { %817 = vrot.lane.b32.xlu0 %v1504_v17, %s1170_s9  ;;  %777 = vrot.lane.b32.xlu1 %v1510_v4, %s1168_s7 }
 0x291   :  { %838 = vrot.lane.b32.xlu0 %v1504_v17, %s1171_s10  ;;  %798 = vrot.lane.b32.xlu1 %v1510_v4, %s1169_s8 }
 0x295   :  { %859 = vrot.lane.b32.xlu0 %v1504_v17, %s1173_s11  ;;  %819 = vrot.lane.b32.xlu1 %v1510_v4, %s1170_s9 }
 0x299   :  { %840 = vrot.lane.b32.xlu1 %v1510_v4, %s1171_s10  ;;  %891 = vperm.xlu0 %1131, %v1500_v14  }
 0x29d   :  { %861 = vrot.lane.b32.xlu1 %v1510_v4, %s1173_s11 }
 0x2a1   :  { %950 = vrot.lane.b32.xlu1 %v1500_v14, %s1175_s26 }
 0x2ef   :  { %v734_v49 = vpop.permute.xlu0 %733  ;;  %v713_v50 = vpop.permute.xlu1 %712 }
 0x2f3   :  { %v755_v52 = vpop.permute.xlu0 %754  ;;  %v715_v53 = vpop.permute.xlu1 %714 }
 0x2f4   :  { %v716_v58 = vsel %vm49_vm0, %v713_v50, %v715_v53  ;;  %v717_v59 = vsel %vm49_vm0, %v715_v53, %v713_v50  ;;  %v852_v50 = vrot.slane %v1067_v42, %v1300_v10 }
 0x2f5   :  { %v729_v60 = vmul.f32 %v722_v54, %v717_v59  ;;  %v730_v61 = vmul.f32 %v726_v55, %v716_v58  ;;  %v869_v54 = vrot.slane %v1068_v51, %v1309_v13  ;;  %v873_v55 = vrot.slane %v1068_v51, %v1300_v10  ;;  %v888_v10 = vld [vmem:[%s1632_s3 + $0x8] sm:$0xff] }
 0x2f7   :  { %v776_v3 = vpop.permute.xlu0 %775  ;;  %v736_v0 = vpop.permute.xlu1 %735 }
 0x2f8   :  { %v737_v1 = vsel %vm89_vm1, %v734_v49, %v736_v0  ;;  %v738_v2 = vsel %vm89_vm1, %v736_v0, %v734_v49  ;;  %v848_v49 = vrot.slane %v1067_v42, %v1309_v13 }
 0x2f9   :  { %v750_v62 = vmul.f32 %v743_v56, %v738_v2  ;;  %v751_v63 = vmul.f32 %v747_v57, %v737_v1 }
 0x2fb   :  { %v878_v7 = vpack.c.bf16 %v750_v62, %v729_v60  ;;  %v757_v8 = vpop.permute.xlu1 %756  ;;  %v879_v11 = vpack.c.bf16 %v751_v63, %v730_v61  ;;  %v797_v12 = vpop.permute.xlu0 %796 }
 0x2fc   :  { %v758_v22 = vsel %vm129_vm2, %v755_v52, %v757_v8  ;;  %v759_v23 = vsel %vm129_vm2, %v757_v8, %v755_v52  ;;  %v1177_v8 = vmov 2  }
 0x2fd   :  { %903 = vmatprep.subr.bf16.mxu0 %v879_v11  ;;  %v771_v29 = vmul.f32 %v764_v16, %v759_v23  ;;  %v772_v30 = vmul.f32 %v768_v18, %v758_v22  ;;  %1132 = vset.pattern.permute.xlu1 %v1177_v8 }
 0x2fe   :  { %904 = vmatpush1.bf16.msra.mxu0 %v878_v7  ;;  %v889_v7 = vpack.c.bf16 %v888_v10, %v888_v10  ;;  %1133 = vset.pattern.permute.xlu0 %v1177_v8 }
 0x2ff   :  { %v778_v24 = vpop.permute.xlu1 %777  ;;  %v818_v33 = vpop.permute.xlu0 %817  ;;  %947 = vperm.xlu1 %1132, %v1500_v14  }
 0x300   :  { %v779_v25 = vsel %vm169_vm3, %v776_v3, %v778_v24  ;;  %v780_v26 = vsel %vm169_vm3, %v778_v24, %v776_v3 }
 0x301   :  { %v792_v31 = vmul.f32 %v785_v19, %v780_v26  ;;  %v793_v32 = vmul.f32 %v789_v20, %v779_v25 }
 0x303   :  { %v880_v34 = vpack.c.bf16 %v792_v31, %v771_v29  ;;  %v799_v35 = vpop.permute.xlu1 %798  ;;  %v881_v36 = vpack.c.bf16 %v793_v32, %v772_v30  ;;  %v839_v46 = vpop.permute.xlu0 %838 }
 0x304   :  { %v800_v37 = vsel %vm209_vm4, %v797_v12, %v799_v35  ;;  %v801_v38 = vsel %vm209_vm4, %v799_v35, %v797_v12 }
 0x305   :  { %v813_v39 = vmul.f32 %v806_v27, %v800_v37  ;;  %v814_v40 = vmul.f32 %v810_v28, %v801_v38  ;;  %905 = vmatprep.subr.bf16.mxu0 %v881_v36 }
 0x306   :  { %906 = vmatpush1.bf16.msra.mxu0 %v880_v34 }
 0x307   :  { %v882_v43 = vpack.c.bf16 %v813_v39, %v1504_v17  ;;  %v820_v44 = vpop.permute.xlu1 %819  ;;  %v883_v45 = vpack.c.bf16 %v814_v40, %v1510_v4  ;;  %v860_v3 = vpop.permute.xlu0 %859 }
 0x308   :  { %v821_v17 = vsel %vm249_vm6, %v818_v33, %v820_v44  ;;  %v822_v4 = vsel %vm249_vm6, %v820_v44, %v818_v33 }
 0x309   :  { %907 = vmatprep.subr.bf16.mxu0 %v883_v45  ;;  %v834_v56 = vmul.f32 %v827_v47, %v821_v17  ;;  %v835_v57 = vmul.f32 %v831_v48, %v822_v4 }
 0x30a   :  { %908 = vmatpush1.bf16.msra.mxu0 %v882_v43 }
 0x30b   :  { %v841_v15 = vpop.permute.xlu1 %840 }
 0x30c   :  { %v842_v52 = vsel %vm289_vm5, %v839_v46, %v841_v15  ;;  %v843_v53 = vsel %vm289_vm5, %v841_v15, %v839_v46 }
 0x30d   :  { %v855_v58 = vmul.f32 %v848_v49, %v842_v52  ;;  %v856_v59 = vmul.f32 %v852_v50, %v843_v53 }
 0x30f   :  { %v884_v0 = vpack.c.bf16 %v855_v58, %v834_v56  ;;  %v862_v1 = vpop.permute.xlu1 %861  ;;  %v885_v2 = vpack.c.bf16 %v856_v59, %v835_v57 }
 0x310   :  { %v863_v60 = vsel %vm329_vm7, %v860_v3, %v862_v1  ;;  %v864_v61 = vsel %vm329_vm7, %v862_v1, %v860_v3 }
 0x311   :  { %v876_v62 = vmul.f32 %v869_v54, %v863_v60  ;;  %v877_v63 = vmul.f32 %v873_v55, %v864_v61  ;;  %909 = vmatprep.subr.bf16.mxu0 %v885_v2 }
 0x312   :  { %910 = vmatpush1.bf16.msra.mxu0 %v884_v0 }
 0x313   :  { %v886_v13 = vpack.c.bf16 %v876_v62, %v876_v62  ;;  %v887_v5 = vpack.c.bf16 %v877_v63, %v877_v63  ;;  %v951_v24 = vpop.permute.xlu1 %950 }
 0x315   :  { %1069 = vmatprep.subr.msk.bf16.mxu0 %vm385_vm8, %v887_v5  ;;  %v898_v6 = vsel %vm385_vm8, %v886_v13, 0 }
 0x316   :  { %912 = vmatpush1.bf16.msra.mxu0 %v898_v6 }
 0x318   :  { %v892_v11 = vpop.permute.xlu0 %891 }
 0x319   :  { %1070 = vmatmul.mubr.msk.bf16.vlgmr.msra.gmra.mrb[8].mxu0 %vm381_vm9, %v889_v7 }
 0x37e   :  { %v948_v25 = vpop.permute.xlu1 %947 }
 0x3ec   :  { %v937_v12 = vpop.f32.mrb[8].mxu0 }
 0x3ed   :  { %v938_v16 = vadd.f32 %v937_v12, %v892_v11  ;;  %v939_v18 = vpop.f32.mrb[9].mxu0 }
 0x3ee   :  { %v940_v19 = vadd.f32 %v939_v18, %v892_v11  ;;  %v941_v20 = vpop.f32.mrb[10].mxu0 }
 0x3ef   :  { %v942_v21 = vpop.f32.mrb[11].mxu0  ;;  %v944_v23 = vmax.f32 %v938_v16, 0.0 }
 0x3f0   :  { %v945_v22 = vmax.f32 %v940_v19, 0.0 }
 0x3f2   :  { %955 = vmatprep.subr.mxu1 %v945_v22 }
 0x3f3   :  { %956 = vmatpush1.msra.mxu1 %v944_v23 }
 0x3f4   :  { %1071 = vmatmul.mubr.msk.f32.vlgmr.msra.gmra.mrb[8].mxu1 %vm952_vm10, %v951_v24 }
 0x4c7   :  { %v1021_v26 = vpop.f32.mrb[8].mxu1 }
 0x4c8   :  { %v1023_v27 = vpop.f32.mrb[9].mxu1  ;;  %v1022_v28 = vadd.f32 %v1021_v26, %v948_v25 }
 0x4c9   :  { %v1024_v29 = vadd.f32 %v1023_v27, %v948_v25 }
 0x4ca   :  { %1026 = vst [vmem:[%s1634_s5] sm:$0xff] %v1022_v28 }
 0x4cb   :  { %1027 = vst [vmem:[%s1634_s5 + $0x8] sm:$0xff] %v1024_v29 }
 0x4cc   :  { %1032 = vsyncpa [#allocation3], 1 }

</bundles_post_ra>
